<compile_context>
chip_gen: v6e
topology: v6e:2x2x1
jax: 0.10.0
libtpu: 0.0.40
codegen_flags: <defaults>
</compile_context>

<pallas_src>
import functools

import jax
import jax.numpy as jnp
from jax.experimental import pallas as pl
from jax.experimental.pallas import tpu as pltpu

_LANE = 128


def _round_up(x: int, m: int) -> int:
    return ((x + m - 1) // m) * m


def _sublane(dtype) -> int:
    # Native packed sublane tile: 8 rows for 32-bit, 16 for bf16, 32 for int8/fp8.
    bits = jnp.dtype(dtype).itemsize * 8
    return max(8, 256 // bits)


def _pick_tile(dim_padded: int, cap: int) -> int:
    """Largest power-of-two tile <= cap (>=128) that divides dim_padded."""
    t = cap
    while t >= _LANE:
        if dim_padded % t == 0:
            return t
        t //= 2
    return dim_padded


# ----------------------------- kernels --------------------------------------


def _linear_kernel_f32out(x_ref, w_ref, b_ref, o_ref, *, precision):
    # f32 output: accumulate directly into the resident output block (its
    # index_map ignores k, so it stays in VMEM across the whole K sweep).
    k = pl.program_id(2)

    @pl.when(k == 0)
    def _init():
        o_ref[...] = jnp.zeros_like(o_ref)

    o_ref[...] += jnp.dot(
        x_ref[...], w_ref[...],
        preferred_element_type=jnp.float32,
        precision=precision,
    )

    @pl.when(k == pl.num_programs(2) - 1)
    def _bias():
        o_ref[...] += b_ref[...]


def _linear_kernel_acc(x_ref, w_ref, b_ref, o_ref, acc_ref, *, precision):
    # Lower-precision output: keep an f32 accumulator scratch, downcast once.
    k = pl.program_id(2)

    @pl.when(k == 0)
    def _init():
        acc_ref[...] = jnp.zeros_like(acc_ref)

    acc_ref[...] += jnp.dot(
        x_ref[...], w_ref[...],
        preferred_element_type=jnp.float32,
        precision=precision,
    )

    @pl.when(k == pl.num_programs(2) - 1)
    def _epilogue():
        o_ref[...] = (acc_ref[...] + b_ref[...]).astype(o_ref.dtype)


# --------------------------- per-call path -----------------------------------


@functools.partial(
    jax.jit,
    static_argnames=("n_out", "tn", "tk", "tm_cap", "mxu_dtype", "out_dtype",
                     "fp32_parity"),
)
def _linear_call(x, wT_p, b_p, *, n_out, tn, tk, tm_cap, mxu_dtype, out_dtype,
                 fp32_parity):
    orig_shape = x.shape
    K = orig_shape[-1]
    x2d = x.reshape(-1, K)
    M = x2d.shape[0]
    Kp, Np = wT_p.shape

    # bf16 fast path casts activations here (cheap, elementwise); f32 is a no-op.
    x2d = x2d.astype(mxu_dtype)

    # ---- M tiling: dtype-aware sublane rounding + waste-minimizing tm pick.
    sub = _sublane(mxu_dtype)
    Mp_min = _round_up(M, sub)
    if Mp_min <= _LANE:
        tm = Mp_min
    else:
        best_pad, tm = None, _LANE
        t = tm_cap
        while t >= _LANE:
            pad = _round_up(M, t) - M
            if best_pad is None or pad < best_pad:
                best_pad, tm = pad, t
            t //= 2
    Mp = _round_up(M, tm)

    # ---- v7x has 2 TensorCores: keep >=1 parallel grid axis with extent >= 2.
    tn_eff = tn
    if Mp // tm == 1:
        while Np // tn_eff < 2 and tn_eff > _LANE:
            tn_eff //= 2

    if (Mp, Kp) != (M, K):
        x2d = jnp.pad(x2d, ((0, Mp - M), (0, Kp - K)))

    grid = (Mp // tm, Np // tn_eff, Kp // tk)

    out_dtype = jnp.dtype(out_dtype)
    f32_out = out_dtype == jnp.dtype(jnp.float32)
    precision = (jax.lax.Precision.HIGHEST
                 if (fp32_parity and jnp.dtype(mxu_dtype) == jnp.dtype(jnp.float32))
                 else None)

    kernel = (functools.partial(_linear_kernel_f32out, precision=precision)
              if f32_out
              else functools.partial(_linear_kernel_acc, precision=precision))
    scratch = [] if f32_out else [pltpu.VMEM((tm, tn_eff), jnp.float32)]

    xb = jnp.dtype(mxu_dtype).itemsize
    ob = out_dtype.itemsize
    # Double-buffered in/out tiles + bias + optional f32 accumulator.
    footprint = (2 * tm * tk * xb + 2 * tk * tn_eff * xb
                 + 2 * tm * tn_eff * ob + 2 * tn_eff * 4
                 + (0 if f32_out else tm * tn_eff * 4))
    vmem_limit = min(max(32 << 20, 2 * footprint), 56 << 20)

    cost = pl.CostEstimate(
        flops=2 * Mp * Np * Kp,
        transcendentals=0,
        bytes_accessed=(grid[1] * Mp * Kp * xb      # x re-streamed per N tile
                        + grid[0] * Kp * Np * xb    # W re-streamed per M tile
                        + Np * 4
                        + Mp * Np * ob),
    )

    out = pl.pallas_call(
        kernel,
        out_shape=jax.ShapeDtypeStruct((Mp, Np), out_dtype),
        grid=grid,
        in_specs=[
            pl.BlockSpec((tm, tk), lambda i, j, k: (i, k)),        # x tile
            pl.BlockSpec((tk, tn_eff), lambda i, j, k: (k, j)),    # W^T tile
            pl.BlockSpec((1, tn_eff), lambda i, j, k: (0, j)),     # bias tile
        ],
        out_specs=pl.BlockSpec((tm, tn_eff), lambda i, j, k: (i, j)),
        scratch_shapes=scratch,
        compiler_params=pltpu.CompilerParams(
            dimension_semantics=("parallel", "parallel", "arbitrary"),
            vmem_limit_bytes=vmem_limit,
        ),
        cost_estimate=cost,
    )(x2d, wT_p, b_p)

    out = out[:M, :n_out]
    return out.reshape(*orig_shape[:-1], n_out)


# --------------------------- public wrappers ---------------------------------


def prepare_standard_linear(weight, bias=None, *, mxu_dtype=None,
                            tn_cap=512, tk_cap=512):
    """One-time weight relayout: weight [out, in] -> padded W^T [Kp, Np],
    bias -> f32 [1, Np]. Call once at init / after a weight update; the
    per-forward path then avoids an extra HBM transpose pass over W."""
    N, K = weight.shape
    w_dtype = jnp.dtype(mxu_dtype) if mxu_dtype is not None else jnp.dtype(weight.dtype)
    if w_dtype == jnp.dtype(jnp.bfloat16):
        tk_cap = max(tk_cap, 1024)   # bf16 operands: fewer K steps, same VMEM

    Np = _round_up(N, _LANE)
    Kp = _round_up(K, _LANE)
    tn = _pick_tile(Np, tn_cap)
    tk = _pick_tile(Kp, tk_cap)

    wT = jnp.asarray(weight, w_dtype).T            # [K, N]
    if (Kp, Np) != (K, N):
        wT = jnp.pad(wT, ((0, Kp - K), (0, Np - N)))

    if bias is None:
        b = jnp.zeros((1, Np), jnp.float32)
    else:
        b = jnp.asarray(bias, jnp.float32).reshape(1, N)
        if Np != N:
            b = jnp.pad(b, ((0, 0), (0, Np - N)))

    return {"wT": wT, "b": b, "N": N, "K": K, "tn": tn, "tk": tk,
            "mxu_dtype": w_dtype}


def standard_linear_apply(x, params, *, out_dtype=None, fp32_parity=True,
                          tm_cap=512):
    if x.shape[-1] != params["K"]:
        raise ValueError(f"x last dim {x.shape[-1]} != in_features {params['K']}")
    out_dtype = jnp.dtype(out_dtype) if out_dtype is not None else jnp.dtype(x.dtype)
    return _linear_call(
        x, params["wT"], params["b"],
        n_out=params["N"], tn=params["tn"], tk=params["tk"], tm_cap=tm_cap,
        mxu_dtype=params["mxu_dtype"], out_dtype=out_dtype,
        fp32_parity=fp32_parity,
    )


def standard_linear(x, weight, bias=None, *, mxu_dtype=None, out_dtype=None,
                    fp32_parity=True):
    """F.linear semantics (convenience path). For repeated calls, use
    prepare_standard_linear(...) once + standard_linear_apply(...) so the
    weight transpose/pad is not rematerialized every forward."""
    params = prepare_standard_linear(weight, bias, mxu_dtype=mxu_dtype)
    return standard_linear_apply(x, params, out_dtype=out_dtype,
                                 fp32_parity=fp32_parity)


def init_standard_linear_params(key, in_features, out_features, dtype=jnp.float32):
    """reset_parameters(): orthogonal init with gain = 1/sqrt(in_features),
    bias ~ U(-stdv, stdv)."""
    stdv = 1.0 / float(jnp.sqrt(jnp.asarray(in_features, dtype=jnp.float32)))
    kw, kb = jax.random.split(key)
    weight = jax.nn.initializers.orthogonal(scale=stdv)(
        kw, (out_features, in_features), dtype
    )
    bias = jax.random.uniform(
        kb, (out_features,), dtype=dtype, minval=-stdv, maxval=stdv
    )
    return weight, bias


# TODO(synk): project_weights / get_linf_projection_threshold (per-row sort +
# cumsum L-inf ball projection) is a training-time utility, not part of the
# forward pass, and is not implemented as a Pallas kernel here.


if __name__ == "__main__":
    key = jax.random.PRNGKey(0)
    k_x, k_p = jax.random.split(key)

    batch, seq, in_features, out_features = 2, 8, 32, 16
    x = jax.random.normal(k_x, (batch, seq, in_features), dtype=jnp.float32)
    weight, bias = init_standard_linear_params(k_p, in_features, out_features)

    y_ref = x @ weight.T + bias

    # Path 1: fp32-parity (f32 operands, HIGHEST matmul precision).
    params_f32 = prepare_standard_linear(weight, bias)          # one-time relayout
    y = jax.block_until_ready(standard_linear_apply(x, params_f32))
    assert y.shape == (batch, seq, out_features)
    assert jnp.allclose(y, y_ref, atol=1e-5, rtol=1e-5)

    # Path 2: bf16 MXU fast path (bf16 operands, f32 accumulation, f32 output).
    params_bf16 = prepare_standard_linear(weight, bias, mxu_dtype=jnp.bfloat16)
    y_fast = jax.block_until_ready(
        standard_linear_apply(x, params_bf16, out_dtype=jnp.float32)
    )
    assert y_fast.shape == (batch, seq, out_features)
    assert jnp.allclose(y_fast, y_ref, atol=5e-2, rtol=5e-2)

    print("KERNEL_OK")
</pallas_src>

<mosaic_0001>
module attributes {stable_mosaic.version = 11 : i64} {
  func.func @_linear_kernel_f32out(%arg0: i32, %arg1: i32, %arg2: i32, %arg3: memref<16x128xf32, #tpu.memory_space<vmem>>, %arg4: memref<128x128xf32, #tpu.memory_space<vmem>>, %arg5: memref<1x128xf32, #tpu.memory_space<vmem>>, %arg6: memref<16x128xf32, #tpu.memory_space<vmem>>) attributes {dimension_semantics = [#tpu.dimension_semantics<parallel>, #tpu.dimension_semantics<parallel>, #tpu.dimension_semantics<arbitrary>], iteration_bounds = array<i64: 1, 1, 1>, scalar_prefetch = 0 : i64, scratch_operands = 0 : i64, tpu.core_type = #tpu.core_type<tc>, window_params = [{transform_indices = @transform_0, window_bounds = array<i64: 16, 128>}, {transform_indices = @transform_1, window_bounds = array<i64: 128, 128>}, {transform_indices = @transform_2, window_bounds = array<i64: 1, 128>}, {transform_indices = @transform_3, window_bounds = array<i64: 16, 128>}]} {
    %c0_i32 = arith.constant 0 : i32
    %0 = arith.cmpi eq, %arg2, %c0_i32 : i32
    %1 = arith.extui %0 : i1 to i32
    %c0_i32_0 = arith.constant 0 : i32
    %2 = arith.cmpi ne, %1, %c0_i32_0 : i32
    scf.if %2 {
      %cst_10 = arith.constant 0.000000e+00 : f32
      %12 = vector.broadcast %cst_10 : f32 to vector<16x128xf32>
      %c0_11 = arith.constant 0 : index
      %c0_12 = arith.constant 0 : index
      %13 = vector.load %arg6[%c0_11, %c0_12] : memref<16x128xf32, #tpu.memory_space<vmem>>, vector<16x128xf32>
      tpu.vector_store %arg6[%c0_11, %c0_12], %12 {strides = array<i32>} : memref<16x128xf32, #tpu.memory_space<vmem>>, vector<16x128xf32>,
    } else {
    }
    %c0 = arith.constant 0 : index
    %c0_1 = arith.constant 0 : index
    %3 = vector.load %arg6[%c0, %c0_1] : memref<16x128xf32, #tpu.memory_space<vmem>>, vector<16x128xf32>
    %c0_2 = arith.constant 0 : index
    %c0_3 = arith.constant 0 : index
    %4 = vector.load %arg3[%c0_2, %c0_3] : memref<16x128xf32, #tpu.memory_space<vmem>>, vector<16x128xf32>
    %c0_4 = arith.constant 0 : index
    %c0_5 = arith.constant 0 : index
    %5 = vector.load %arg4[%c0_4, %c0_5] : memref<128x128xf32, #tpu.memory_space<vmem>>, vector<128x128xf32>
    %cst = arith.constant dense<0.000000e+00> : vector<16x128xf32>
    %6 = tpu.matmul %4, %5, %cst {dimension_numbers = #tpu.dot_dimension_numbers<[1], [0], [0], [1], [0, 0, 1, 1], [], []>, precision = #tpu.contract_precision<fp32>} : vector<16x128xf32>, vector<128x128xf32>, vector<16x128xf32> -> vector<16x128xf32>
    %7 = arith.addf %3, %6 : vector<16x128xf32>
    %c0_6 = arith.constant 0 : index
    %c0_7 = arith.constant 0 : index
    %8 = vector.load %arg6[%c0_6, %c0_7] : memref<16x128xf32, #tpu.memory_space<vmem>>, vector<16x128xf32>
    tpu.vector_store %arg6[%c0_6, %c0_7], %7 {strides = array<i32>} : memref<16x128xf32, #tpu.memory_space<vmem>>, vector<16x128xf32>,
    %c0_i32_8 = arith.constant 0 : i32
    %9 = arith.cmpi eq, %arg2, %c0_i32_8 : i32
    %10 = arith.extui %9 : i1 to i32
    %c0_i32_9 = arith.constant 0 : i32
    %11 = arith.cmpi ne, %10, %c0_i32_9 : i32
    scf.if %11 {
      %c0_10 = arith.constant 0 : index
      %c0_11 = arith.constant 0 : index
      %12 = vector.load %arg6[%c0_10, %c0_11] : memref<16x128xf32, #tpu.memory_space<vmem>>, vector<16x128xf32>
      %c0_12 = arith.constant 0 : index
      %c0_13 = arith.constant 0 : index
      %13 = vector.load %arg5[%c0_12, %c0_13] : memref<1x128xf32, #tpu.memory_space<vmem>>, vector<1x128xf32>
      %14 = vector.broadcast %13 : vector<1x128xf32> to vector<16x128xf32>
      %15 = arith.addf %12, %14 : vector<16x128xf32>
      %c0_14 = arith.constant 0 : index
      %c0_15 = arith.constant 0 : index
      %16 = vector.load %arg6[%c0_14, %c0_15] : memref<16x128xf32, #tpu.memory_space<vmem>>, vector<16x128xf32>
      tpu.vector_store %arg6[%c0_14, %c0_15], %15 {strides = array<i32>} : memref<16x128xf32, #tpu.memory_space<vmem>>, vector<16x128xf32>,
    } else {
    }
    return
  }
  func.func @transform_0(%arg0: i32, %arg1: i32, %arg2: i32) -> (i32, i32) {
    %c0_i32 = arith.constant 0 : i32
    return %arg0, %arg2 : i32, i32
  }
  func.func @transform_1(%arg0: i32, %arg1: i32, %arg2: i32) -> (i32, i32) {
    %c0_i32 = arith.constant 0 : i32
    return %arg2, %arg1 : i32, i32
  }
  func.func @transform_2(%arg0: i32, %arg1: i32, %arg2: i32) -> (i32, i32) {
    %c0_i32 = arith.constant 0 : i32
    %c0_i32_0 = arith.constant 0 : i32
    return %c0_i32, %arg1 : i32, i32
  }
  func.func @transform_3(%arg0: i32, %arg1: i32, %arg2: i32) -> (i32, i32) {
    %c0_i32 = arith.constant 0 : i32
    return %arg0, %arg1 : i32, i32
  }
}

</mosaic_0001>

<bundles_post_ra>
// kernel: _linear_call.1
= control target key start
LH: loop header
LB: loop body
LE: loop exit
PB: predicated region body
PF: predicated region fallthrough
CT: control target
= control target key end

     0   :  { %8 = vsyncpa [#allocation3], 0  ;;  %s1108_s12 = smov [#allocation2]   ;;  %s1499_s0 = inlined_call_operand.vmem [shape: f32[16,128], index: 0, kind: input, shape index: {}]   ;;  %s1500_s1 = inlined_call_operand.hbm [shape: f32[128,128], index: 1, kind: input, shape index: {}]   ;;  %s1501_s2 = inlined_call_operand.vmem [shape: f32[1,128], index: 2, kind: input, shape index: {}]   ;;  %s1502_s3 = inlined_call_operand.vmem [shape: f32[16,128], index: 3, kind: output, shape index: {}]  }
   0x1   :  { %s16_s13 = sshll.u32 %s1108_s12, 4  ;;  %s17_s13 = int_to_ptr.vmem [resolvable:$true] %s16_s13 }
   0x2   :  { %s1094_s14 = scalar_lea.vmem %s17_s13, 2048  ;;  %p1099_p1 = scmp.lt.s32.totalorder %s17_s13, %s17_s13 }
   0x3   :  { %p1095_p0 = scmp.ne.s32.totalorder %s17_s13, %s1094_s14  ;;  %p1100_p2 = scmp.lt.s32.totalorder %s1094_s14, %s1094_s14 }
   0x5   :  { %p1101_p3 = por %p1100_p2, %p1099_p1 }
   0x7   :  { %p1102_p4 = pnand %p1101_p3, %p1095_p0 }
   0x9   :  { %1105 = shalt.err (!%p1102_p4)
}
   0xa   :  { %s1109_s15 = smov 128   ;;  %s1110_s16 = smov 8  }
   0xb   :  { %22 = dma.hbm_to_vmem [thread:$0]  %s1500_s1, 2048, %s17_s13, [#allocation3], %s1109_s15, %s1109_s15, %s1110_s16  }
   0xc   :  { %1106 = dma.done.wait [#allocation3], 2048  }
   0xd   :  { %1107 = vsyncadd [#allocation3], 4294965248  ;;  %v53_v0 = vld [vmem:[#allocation2 + $0x78] sm:$0xff]  ;;  %v52_v1 = vld [vmem:[#allocation2 + $0x70] sm:$0xff] }
   0xe   :  { %v51_v2 = vld [vmem:[#allocation2 + $0x68] sm:$0xff]  ;;  %v1134_v3 = vand.u32 4294901760, %v53_v0  ;;  %v1136_v4 = vand.u32 4294901760, %v52_v1  ;;  %v50_v6 = vld [vmem:[#allocation2 + $0x60] sm:$0xff]  ;;  %v49_v7 = vld [vmem:[#allocation2 + $0x58] sm:$0xff] }
   0xf   :  { %v1138_v5 = vand.u32 4294901760, %v51_v2  ;;  %v48_v8 = vld [vmem:[#allocation2 + $0x50] sm:$0xff]  ;;  %v1140_v9 = vand.u32 4294901760, %v50_v6  ;;  %v1142_v10 = vand.u32 4294901760, %v49_v7  ;;  %v47_v12 = vld [vmem:[#allocation2 + $0x48] sm:$0xff]  ;;  %v46_v13 = vld [vmem:[#allocation2 + $0x40] sm:$0xff] }
  0x10   :  { %v1144_v11 = vand.u32 4294901760, %v48_v8  ;;  %872 = vmatprep.subr.mxu0 %v1134_v3  ;;  %v1148_v14 = vsub.f32 %v53_v0, %v1134_v3  ;;  %v1151_v15 = vsub.f32 %v52_v1, %v1136_v4  ;;  %v1153_v16 = vand.u32 4294901760, %v47_v12  ;;  %v45_v18 = vld [vmem:[#allocation2 + $0x38] sm:$0xff]  ;;  %v44_v25 = vld [vmem:[#allocation2 + $0x30] sm:$0xff]  ;;  %v43_v35 = vld [vmem:[#allocation2 + $0x28] sm:$0xff] }
  0x11   :  { %v1156_v17 = vsub.f32 %v51_v2, %v1138_v5  ;;  %873 = vmatpush3.msra.mxu0 %v1134_v3  ;;  %v1160_v19 = vsub.f32 %v50_v6, %v1140_v9  ;;  %v1163_v20 = vsub.f32 %v49_v7, %v1142_v10  ;;  %v1175_v24 = vand.u32 4294901760, %v46_v13  ;;  %v42_v40 = vld [vmem:[#allocation2 + $0x20] sm:$0xff]  ;;  %v41_v48 = vld [vmem:[#allocation2 + $0x18] sm:$0xff]  ;;  %v37_v54 = vld [vmem:[%s1499_s0 + $0x8] sm:$0xff] }
  0x12   :  { %874 = vmatprep.subr.mxu0 %v1136_v4  ;;  %v1167_v21 = vand.u32 4294901760, %v1148_v14  ;;  %v1170_v22 = vand.u32 4294901760, %v1151_v15  ;;  %v1181_v27 = vand.u32 4294901760, %v45_v18  ;;  %v1187_v29 = vsub.f32 %v48_v8, %v1144_v11  ;;  %v36_v49 = vld [vmem:[%s1499_s0] sm:$0xff]  ;;  %v40_v59 = vld [vmem:[#allocation2 + $0x10] sm:$0xff]  ;;  %v39_v2 = vld [vmem:[#allocation2 + $0x8] sm:$0xff] }
  0x13   :  { %v1173_v23 = vand.u32 4294901760, %v1156_v17  ;;  %875 = vmatpush3.msra.mxu0 %v1136_v4  ;;  %v1179_v26 = vand.u32 4294901760, %v1160_v19  ;;  %v1184_v28 = vand.u32 4294901760, %v1163_v20  ;;  %v1197_v33 = vsub.f32 %v47_v12, %v1153_v16 }
  0x14   :  { %876 = vmatprep.subr.mxu0 %v1138_v5  ;;  %v159_v30 = vsub.f32 %v1148_v14, %v1167_v21  ;;  %v166_v31 = vsub.f32 %v1151_v15, %v1170_v22  ;;  %v1200_v34 = vand.u32 4294901760, %v44_v25  ;;  %v1206_v39 = vand.u32 4294901760, %v1187_v29 }
  0x15   :  { %v173_v32 = vsub.f32 %v1156_v17, %v1173_v23  ;;  %877 = vmatpush3.msra.mxu0 %v1138_v5  ;;  %v180_v38 = vsub.f32 %v1160_v19, %v1179_v26  ;;  %v187_v41 = vsub.f32 %v1163_v20, %v1184_v28  ;;  %v1212_v42 = vand.u32 4294901760, %v1197_v33 }
  0x16   :  { %878 = vmatprep.subr.mxu0 %v1140_v9  ;;  %v160_v36 = vand.u32 4294901760, %v159_v30  ;;  %v167_v37 = vand.u32 4294901760, %v166_v31  ;;  %v1215_v43 = vsub.f32 %v46_v13, %v1175_v24  ;;  %v1218_v45 = vand.u32 4294901760, %v43_v35 }
  0x17   :  { %879 = vmatpush3.msra.mxu0 %v1140_v9  ;;  %v174_v44 = vand.u32 4294901760, %v173_v32  ;;  %v1221_v46 = vsub.f32 %v45_v18, %v1181_v27  ;;  %v1224_v47 = vand.u32 4294901760, %v42_v40  ;;  %v181_v50 = vand.u32 4294901760, %v180_v38  ;;  %v38_v18 = vld [vmem:[#allocation2] sm:$0xff] }
  0x18   :  { %880 = vmatprep.subr.mxu0 %v1142_v10  ;;  %907 = vmatprep.subr.mxu1 %v160_v36  ;;  %v194_v51 = vsub.f32 %v1187_v29, %v1206_v39  ;;  %v1233_v52 = vand.u32 4294901760, %v1215_v43  ;;  %v1236_v53 = vsub.f32 %v44_v25, %v1200_v34  ;;  %v188_v55 = vand.u32 4294901760, %v187_v41 }
  0x19   :  { %881 = vmatpush3.msra.mxu0 %v1142_v10  ;;  %908 = vmatpush3.msra.mxu1 %v160_v36  ;;  %v201_v56 = vsub.f32 %v1197_v33, %v1212_v42  ;;  %v1245_v57 = vand.u32 4294901760, %v41_v48  ;;  %v1248_v58 = vand.u32 4294901760, %v1221_v46  ;;  %v1251_v60 = vsub.f32 %v43_v35, %v1218_v45 }
  0x1a   :  { %882 = vmatprep.subr.mxu0 %v1144_v11  ;;  %909 = vmatprep.subr.mxu1 %v167_v37  ;;  %v1253_v61 = vand.u32 4294901760, %v36_v49  ;;  %v1256_v62 = vand.u32 4294901760, %v37_v54  ;;  %v195_v63 = vand.u32 4294901760, %v194_v51  ;;  %v208_v0 = vsub.f32 %v1215_v43, %v1233_v52 }
  0x1b   :  { %883 = vmatpush3.msra.mxu0 %v1144_v11  ;;  %910 = vmatpush3.msra.mxu1 %v167_v37  ;;  %v1262_v1 = vand.u32 4294901760, %v1236_v53  ;;  %v1265_v6 = vsub.f32 %v42_v40, %v1224_v47  ;;  %v202_v7 = vand.u32 4294901760, %v201_v56  ;;  %v1268_v8 = vand.u32 4294901760, %v40_v59 }
  0x1c   :  { %884 = vmatprep.subr.mxu0 %v1153_v16  ;;  %911 = vmatprep.subr.mxu1 %v174_v44  ;;  %v215_v12 = vsub.f32 %v1221_v46, %v1248_v58  ;;  %v1274_v13 = vand.u32 4294901760, %v1251_v60  ;;  %v1277_v25 = vsub.f32 %v36_v49, %v1253_v61  ;;  %v1280_v30 = vsub.f32 %v41_v48, %v1245_v57 }
  0x1d   :  { %885 = vmatpush3.msra.mxu0 %v1153_v16  ;;  %912 = vmatpush3.msra.mxu1 %v174_v44  ;;  %v1283_v31 = vand.u32 4294901760, %v39_v2  ;;  %v1286_v32 = vsub.f32 %v37_v54, %v1256_v62  ;;  %v209_v35 = vand.u32 4294901760, %v208_v0  ;;  %v222_v36 = vsub.f32 %v1236_v53, %v1262_v1 }
  0x1e   :  { %886 = vmatprep.subr.mxu0 %v1175_v24  ;;  %913 = vmatprep.subr.mxu1 %v181_v50  ;;  %v1292_v37 = vand.u32 4294901760, %v1265_v6  ;;  %v1295_v38 = vand.u32 4294901760, %v38_v18  ;;  %v1298_v40 = vsub.f32 %v40_v59, %v1268_v8  ;;  %v216_v41 = vand.u32 4294901760, %v215_v12 }
  0x1f   :  { %887 = vmatpush3.msra.mxu0 %v1175_v24  ;;  %914 = vmatpush3.msra.mxu1 %v181_v50  ;;  %v229_v44 = vsub.f32 %v1251_v60, %v1274_v13  ;;  %v1504_v48 = vand.u32 4294901760, %v1277_v25  ;;  %v1305_v49 = vand.u32 4294901760, %v1280_v30  ;;  %v1503_v50 = vand.u32 4294901760, %v1286_v32 }
  0x20   :  { %888 = vmatprep.subr.mxu0 %v1181_v27  ;;  %915 = vmatprep.subr.mxu1 %v188_v55  ;;  %v1310_v51 = vsub.f32 %v39_v2, %v1283_v31  ;;  %v223_v54 = vand.u32 4294901760, %v222_v36  ;;  %v1317_v56 = vand.u32 4294901760, %v1298_v40  ;;  %v1320_v59 = vsub.f32 %v38_v18, %v1295_v38 }
  0x21   :  { %889 = vmatpush3.msra.mxu0 %v1181_v27  ;;  %916 = vmatpush3.msra.mxu1 %v188_v55  ;;  %v236_v55 = vsub.f32 %v1265_v6, %v1292_v37  ;;  %v138_v0 = vsub.f32 %v1277_v25, %v1504_v48  ;;  %v243_v2 = vsub.f32 %v1280_v30, %v1305_v49 }
  0x22   :  { %890 = vmatprep.subr.mxu0 %v1200_v34  ;;  %917 = vmatprep.subr.mxu1 %v195_v63  ;;  %v1333_v12 = vand.u32 4294901760, %v1310_v51  ;;  %v1340_v36 = vand.u32 4294901760, %v1320_v59 }
  0x23   :  { %891 = vmatpush3.msra.mxu0 %v1200_v34  ;;  %918 = vmatpush3.msra.mxu1 %v195_v63  ;;  %v230_v63 = vand.u32 4294901760, %v229_v44  ;;  %v237_v18 = vand.u32 4294901760, %v236_v55  ;;  %v244_v44 = vand.u32 4294901760, %v243_v2 }
  0x24   :  { %892 = vmatprep.subr.mxu0 %v1218_v45  ;;  %919 = vmatprep.subr.mxu1 %v202_v7  ;;  %v257_v55 = vsub.f32 %v1310_v51, %v1333_v12  ;;  %v264_v48 = vsub.f32 %v1320_v59, %v1340_v36 }
  0x25   :  { %893 = vmatpush3.msra.mxu0 %v1218_v45  ;;  %920 = vmatpush3.msra.mxu1 %v202_v7  ;;  %v148_v7 = vsub.f32 %v1286_v32, %v1503_v50 }
  0x26   :  { %894 = vmatprep.subr.mxu0 %v1224_v47  ;;  %921 = vmatprep.subr.mxu1 %v209_v35 }
  0x27   :  { %895 = vmatpush3.msra.mxu0 %v1224_v47  ;;  %922 = vmatpush3.msra.mxu1 %v209_v35  ;;  %v250_v35 = vsub.f32 %v1298_v40, %v1317_v56  ;;  %v149_v50 = vand.u32 4294901760, %v148_v7 }
  0x28   :  { %896 = vmatprep.subr.mxu0 %v1245_v57  ;;  %923 = vmatprep.subr.mxu1 %v216_v41 }
  0x29   :  { %897 = vmatpush3.msra.mxu0 %v1245_v57  ;;  %924 = vmatpush3.msra.mxu1 %v216_v41  ;;  %v139_v41 = vand.u32 4294901760, %v138_v0  ;;  %v265_v0 = vand.u32 4294901760, %v264_v48 }
  0x2a   :  { %898 = vmatprep.subr.mxu0 %v1268_v8  ;;  %925 = vmatprep.subr.mxu1 %v223_v54 }
  0x2b   :  { %899 = vmatpush3.msra.mxu0 %v1268_v8  ;;  %926 = vmatpush3.msra.mxu1 %v223_v54  ;;  %v251_v54 = vand.u32 4294901760, %v250_v35 }
  0x2c   :  { %900 = vmatprep.subr.mxu0 %v1283_v31  ;;  %927 = vmatprep.subr.mxu1 %v230_v63 }
  0x2d   :  { %901 = vmatpush3.msra.mxu0 %v1283_v31  ;;  %928 = vmatpush3.msra.mxu1 %v230_v63  ;;  %v258_v63 = vand.u32 4294901760, %v257_v55 }
  0x2e   :  { %902 = vmatprep.subr.mxu0 %v1295_v38  ;;  %929 = vmatprep.subr.mxu1 %v237_v18 }
  0x2f   :  { %903 = vmatpush3.msra.mxu0 %v1295_v38  ;;  %930 = vmatpush3.msra.mxu1 %v237_v18 }
  0x30   :  { %904 = vmatprep.mubr.f32.mxu0 %v139_v41  ;;  %931 = vmatprep.subr.mxu1 %v244_v44 }
  0x31   :  { %942 = vmatprep.subr.mxu0 %v1148_v14  ;;  %905 = vmatmul.mubr.f32.vlgmr.msra.gmra.mxu0 %v149_v50 }
  0x32   :  { %932 = vmatpush3.msra.mxu1 %v244_v44  ;;  %943 = vmatpush3.msra.mxu0 %v1148_v14  ;;  %v1505_v14 = vand.u32 4294901760, %v1277_v25 }
  0x33   :  { %933 = vmatprep.subr.mxu1 %v251_v54  ;;  %944 = vmatprep.subr.mxu0 %v1151_v15 }
  0x34   :  { %934 = vmatpush3.msra.mxu1 %v251_v54  ;;  %945 = vmatpush3.msra.mxu0 %v1151_v15  ;;  %v1506_v15 = vand.u32 4294901760, %v1286_v32 }
  0x35   :  { %935 = vmatprep.subr.mxu1 %v258_v63  ;;  %946 = vmatprep.subr.mxu0 %v1156_v17 }
  0x36   :  { %936 = vmatpush3.msra.mxu1 %v258_v63  ;;  %947 = vmatpush3.msra.mxu0 %v1156_v17 }
  0x37   :  { %937 = vmatprep.subr.mxu1 %v265_v0  ;;  %948 = vmatprep.subr.mxu0 %v1160_v19 }
  0x38   :  { %938 = vmatpush3.msra.mxu1 %v265_v0  ;;  %939 = vmatprep.mubr.f32.mxu1 %v1253_v61 }
  0x39   :  { %949 = vmatpush3.msra.mxu0 %v1160_v19  ;;  %940 = vmatmul.mubr.f32.vlgmr.msra.gmra.mxu1 %v1256_v62 }
  0x3a   :  { %950 = vmatprep.subr.mxu0 %v1163_v20  ;;  %977 = vmatprep.subr.mxu1 %v1134_v3 }
  0x3b   :  { %951 = vmatpush3.msra.mxu0 %v1163_v20  ;;  %978 = vmatpush3.msra.mxu1 %v1134_v3 }
  0x3c   :  { %952 = vmatprep.subr.mxu0 %v1187_v29  ;;  %979 = vmatprep.subr.mxu1 %v1136_v4 }
  0x3d   :  { %953 = vmatpush3.msra.mxu0 %v1187_v29  ;;  %980 = vmatpush3.msra.mxu1 %v1136_v4 }
  0x3e   :  { %954 = vmatprep.subr.mxu0 %v1197_v33  ;;  %981 = vmatprep.subr.mxu1 %v1138_v5 }
  0x3f   :  { %955 = vmatpush3.msra.mxu0 %v1197_v33  ;;  %982 = vmatpush3.msra.mxu1 %v1138_v5 }
  0x40   :  { %956 = vmatprep.subr.mxu0 %v1215_v43  ;;  %983 = vmatprep.subr.mxu1 %v1140_v9 }
  0x41   :  { %957 = vmatpush3.msra.mxu0 %v1215_v43  ;;  %984 = vmatpush3.msra.mxu1 %v1140_v9 }
  0x42   :  { %958 = vmatprep.subr.mxu0 %v1221_v46  ;;  %985 = vmatprep.subr.mxu1 %v1142_v10 }
  0x43   :  { %959 = vmatpush3.msra.mxu0 %v1221_v46  ;;  %986 = vmatpush3.msra.mxu1 %v1142_v10 }
  0x44   :  { %960 = vmatprep.subr.mxu0 %v1236_v53  ;;  %987 = vmatprep.subr.mxu1 %v1144_v11 }
  0x45   :  { %961 = vmatpush3.msra.mxu0 %v1236_v53  ;;  %988 = vmatpush3.msra.mxu1 %v1144_v11 }
  0x46   :  { %962 = vmatprep.subr.mxu0 %v1251_v60  ;;  %989 = vmatprep.subr.mxu1 %v1153_v16 }
  0x47   :  { %963 = vmatpush3.msra.mxu0 %v1251_v60  ;;  %990 = vmatpush3.msra.mxu1 %v1153_v16 }
  0x48   :  { %964 = vmatprep.subr.mxu0 %v1265_v6  ;;  %991 = vmatprep.subr.mxu1 %v1175_v24 }
  0x49   :  { %965 = vmatpush3.msra.mxu0 %v1265_v6  ;;  %992 = vmatpush3.msra.mxu1 %v1175_v24 }
  0x4a   :  { %966 = vmatprep.subr.mxu0 %v1280_v30  ;;  %993 = vmatprep.subr.mxu1 %v1181_v27 }
  0x4b   :  { %967 = vmatpush3.msra.mxu0 %v1280_v30  ;;  %994 = vmatpush3.msra.mxu1 %v1181_v27 }
  0x4c   :  { %968 = vmatprep.subr.mxu0 %v1298_v40  ;;  %995 = vmatprep.subr.mxu1 %v1200_v34 }
  0x4d   :  { %969 = vmatpush3.msra.mxu0 %v1298_v40  ;;  %996 = vmatpush3.msra.mxu1 %v1200_v34 }
  0x4e   :  { %970 = vmatprep.subr.mxu0 %v1310_v51  ;;  %997 = vmatprep.subr.mxu1 %v1218_v45 }
  0x4f   :  { %971 = vmatpush3.msra.mxu0 %v1310_v51  ;;  %998 = vmatpush3.msra.mxu1 %v1218_v45 }
  0x50   :  { %972 = vmatprep.subr.mxu0 %v1320_v59  ;;  %999 = vmatprep.subr.mxu1 %v1224_v47 }
  0x51   :  { %973 = vmatpush3.msra.mxu0 %v1320_v59  ;;  %974 = vmatprep.mubr.f32.mxu0 %v1277_v25 }
  0x52   :  { %1000 = vmatpush3.msra.mxu1 %v1224_v47  ;;  %975 = vmatmul.mubr.f32.vlgmr.msra.gmra.mxu0 %v1286_v32 }
  0x53   :  { %1001 = vmatprep.subr.mxu1 %v1245_v57  ;;  %1012 = vmatprep.subr.mxu0 %v1167_v21 }
  0x54   :  { %1002 = vmatpush3.msra.mxu1 %v1245_v57  ;;  %1013 = vmatpush3.msra.mxu0 %v1167_v21 }
  0x55   :  { %1003 = vmatprep.subr.mxu1 %v1268_v8  ;;  %1014 = vmatprep.subr.mxu0 %v1170_v22 }
  0x56   :  { %1004 = vmatpush3.msra.mxu1 %v1268_v8  ;;  %1015 = vmatpush3.msra.mxu0 %v1170_v22 }
  0x57   :  { %1005 = vmatprep.subr.mxu1 %v1283_v31  ;;  %1016 = vmatprep.subr.mxu0 %v1173_v23 }
  0x58   :  { %1006 = vmatpush3.msra.mxu1 %v1283_v31  ;;  %1017 = vmatpush3.msra.mxu0 %v1173_v23 }
  0x59   :  { %1007 = vmatprep.subr.mxu1 %v1295_v38  ;;  %1018 = vmatprep.subr.mxu0 %v1179_v26 }
  0x5a   :  { %1008 = vmatpush3.msra.mxu1 %v1295_v38  ;;  %1009 = vmatprep.mubr.f32.mxu1 %v1505_v14 }
  0x5b   :  { %1019 = vmatpush3.msra.mxu0 %v1179_v26  ;;  %1010 = vmatmul.mubr.f32.vlgmr.msra.gmra.mxu1 %v1506_v15 }
  0x5c   :  { %1020 = vmatprep.subr.mxu0 %v1184_v28  ;;  %1047 = vmatprep.subr.mxu1 %v1134_v3 }
  0x5d   :  { %1021 = vmatpush3.msra.mxu0 %v1184_v28  ;;  %1048 = vmatpush3.msra.mxu1 %v1134_v3 }
  0x5e   :  { %1022 = vmatprep.subr.mxu0 %v1206_v39  ;;  %1049 = vmatprep.subr.mxu1 %v1136_v4 }
  0x5f   :  { %1023 = vmatpush3.msra.mxu0 %v1206_v39  ;;  %1050 = vmatpush3.msra.mxu1 %v1136_v4  ;;  %v763_v39 = vld [vmem:[%s1501_s2] ss:$0 sm:$0xff] }
  0x60   :  { %1024 = vmatprep.subr.mxu0 %v1212_v42  ;;  %1051 = vmatprep.subr.mxu1 %v1138_v5 }
  0x61   :  { %1025 = vmatpush3.msra.mxu0 %v1212_v42  ;;  %1052 = vmatpush3.msra.mxu1 %v1138_v5 }
  0x62   :  { %1026 = vmatprep.subr.mxu0 %v1233_v52  ;;  %1053 = vmatprep.subr.mxu1 %v1140_v9 }
  0x63   :  { %1027 = vmatpush3.msra.mxu0 %v1233_v52  ;;  %1054 = vmatpush3.msra.mxu1 %v1140_v9 }
  0x64   :  { %1028 = vmatprep.subr.mxu0 %v1248_v58  ;;  %1055 = vmatprep.subr.mxu1 %v1142_v10 }
  0x65   :  { %1029 = vmatpush3.msra.mxu0 %v1248_v58  ;;  %1056 = vmatpush3.msra.mxu1 %v1142_v10 }
  0x66   :  { %1030 = vmatprep.subr.mxu0 %v1262_v1  ;;  %1057 = vmatprep.subr.mxu1 %v1144_v11 }
  0x67   :  { %1031 = vmatpush3.msra.mxu0 %v1262_v1  ;;  %1058 = vmatpush3.msra.mxu1 %v1144_v11 }
  0x68   :  { %1032 = vmatprep.subr.mxu0 %v1274_v13  ;;  %1059 = vmatprep.subr.mxu1 %v1153_v16 }
  0x69   :  { %1033 = vmatpush3.msra.mxu0 %v1274_v13  ;;  %1060 = vmatpush3.msra.mxu1 %v1153_v16 }
  0x6a   :  { %1034 = vmatprep.subr.mxu0 %v1292_v37  ;;  %1061 = vmatprep.subr.mxu1 %v1175_v24 }
  0x6b   :  { %1035 = vmatpush3.msra.mxu0 %v1292_v37  ;;  %1062 = vmatpush3.msra.mxu1 %v1175_v24 }
  0x6c   :  { %1036 = vmatprep.subr.mxu0 %v1305_v49  ;;  %1063 = vmatprep.subr.mxu1 %v1181_v27 }
  0x6d   :  { %1037 = vmatpush3.msra.mxu0 %v1305_v49  ;;  %1064 = vmatpush3.msra.mxu1 %v1181_v27 }
  0x6e   :  { %1038 = vmatprep.subr.mxu0 %v1317_v56  ;;  %1065 = vmatprep.subr.mxu1 %v1200_v34 }
  0x6f   :  { %1039 = vmatpush3.msra.mxu0 %v1317_v56  ;;  %1066 = vmatpush3.msra.mxu1 %v1200_v34 }
  0x70   :  { %1040 = vmatprep.subr.mxu0 %v1333_v12  ;;  %1067 = vmatprep.subr.mxu1 %v1218_v45 }
  0x71   :  { %1041 = vmatpush3.msra.mxu0 %v1333_v12  ;;  %1068 = vmatpush3.msra.mxu1 %v1218_v45 }
  0x72   :  { %1042 = vmatprep.subr.mxu0 %v1340_v36  ;;  %1069 = vmatprep.subr.mxu1 %v1224_v47 }
  0x73   :  { %1043 = vmatpush3.msra.mxu0 %v1340_v36  ;;  %1044 = vmatprep.mubr.f32.mxu0 %v1253_v61 }
  0x74   :  { %1070 = vmatpush3.msra.mxu1 %v1224_v47  ;;  %1045 = vmatmul.mubr.f32.vlgmr.msra.gmra.mxu0 %v1256_v62 }
  0x75   :  { %1071 = vmatprep.subr.mxu1 %v1245_v57  ;;  %1079 = vmatprep.mubr.f32.mxu1 %v1253_v61 }
  0x76   :  { %1072 = vmatpush3.msra.mxu1 %v1245_v57 }
  0x77   :  { %1073 = vmatprep.subr.mxu1 %v1268_v8 }
  0x78   :  { %1074 = vmatpush3.msra.mxu1 %v1268_v8 }
  0x79   :  { %1075 = vmatprep.subr.mxu1 %v1283_v31 }
  0x7a   :  { %1076 = vmatpush3.msra.mxu1 %v1283_v31 }
  0x7b   :  { %1077 = vmatprep.subr.mxu1 %v1295_v38 }
  0x7c   :  { %1078 = vmatpush3.msra.mxu1 %v1295_v38 }
  0x7d   :  { %1080 = vmatmul.mubr.f32.vlgmr.msra.gmra.mxu1 %v1256_v62 }
  0xf1   :  { %v906_v3 = vpop.f32.mrf.mxu0 }
  0xf3   :  { %v141_v4 = vpop.f32.mrf.mxu0 }
  0xf9   :  { %v941_v5 = vpop.f32.mrf.mxu1 }
  0xfa   :  { %v309_v17 = vadd.f32 %v941_v5, %v906_v3 }
  0xfb   :  { %v302_v10 = vpop.f32.mrf.mxu1 }
  0xfc   :  { %v303_v20 = vadd.f32 %v302_v10, %v141_v4 }
 0x112   :  { %v976_v9 = vpop.f32.mrf.mxu0 }
 0x113   :  { %v420_v21 = vadd.f32 %v976_v9, %v309_v17 }
 0x114   :  { %v412_v11 = vpop.f32.mrf.mxu0 }
 0x115   :  { %v413_v23 = vadd.f32 %v412_v11, %v303_v20 }
 0x11b   :  { %v1011_v16 = vpop.f32.mrf.mxu1 }
 0x11c   :  { %v517_v24 = vadd.f32 %v1011_v16, %v420_v21 }
 0x11d   :  { %v508_v22 = vpop.f32.mrf.mxu1 }
 0x11e   :  { %v509_v27 = vadd.f32 %v508_v22, %v413_v23 }
 0x134   :  { %v1046_v19 = vpop.f32.mrf.mxu0 }
 0x135   :  { %v642_v28 = vadd.f32 %v1046_v19, %v517_v24 }
 0x136   :  { %v635_v26 = vpop.f32.mrf.mxu0 }
 0x137   :  { %v636_v33 = vadd.f32 %v635_v26, %v509_v27 }
 0x13d   :  { %v1081_v29 = vpop.f32.mrf.mxu1 }
 0x13e   :  { %v735_v34 = vadd.f32 %v1081_v29, %v642_v28 }
 0x13f   :  { %v728_v42 = vpop.f32.mrf.mxu1 }
 0x140   :  { %v729_v43 = vadd.f32 %v728_v42, %v636_v33  ;;  %v755_v45 = vadd.f32 %v763_v39, %v735_v34 }
 0x142   :  { %757 = vst [vmem:[%s1502_s3 + $0x8] sm:$0xff] %v755_v45  ;;  %v754_v46 = vadd.f32 %v763_v39, %v729_v43 }
 0x144   :  { %756 = vst [vmem:[%s1502_s3] sm:$0xff] %v754_v46 }
 0x145   :  { %762 = vsyncpa [#allocation3], 1 }

</bundles_post_ra>
